<compile_context>
chip_gen: v7x
topology: tpu7x:2x2x1
jax: 0.10.0
libtpu: 0.0.40
codegen_flags: <defaults>
</compile_context>

<pallas_src>
import functools

import jax
import jax.numpy as jnp
from jax.experimental import pallas as pl
from jax.experimental.pallas import tpu as pltpu

K_KERNELS = 4  # K of Dynamic_conv2d


# ----------------------------------------------------------------------------
# Pallas kernels (heavy, spatial-streaming part only)
# ----------------------------------------------------------------------------
def _dyn_conv1x1_kernel(w_ref, b_ref, x_ref, o_ref):
    """Aggregated dynamic 1x1 conv on one (batch, HW-tile) block.

    w: (1, Cout, Cin)   per-batch aggregated weight  (sum_k a_k W_k)
    b: (1, Cout, 1)     per-batch aggregated bias
    x: (1, Cin, THW)    channels on sublanes, spatial tile on lanes
    o: (1, Cout, THW)
    """
    o_ref[0] = (
        jnp.dot(w_ref[0], x_ref[0], preferred_element_type=jnp.float32)
        + b_ref[0]
    )


def _fused_ca_dl1_kernel(wa_ref, wb_ref, b_ref, xa_ref, xb_ref, o_ref):
    """Fused CA (channel mask, pre-folded into W) + dl1 aggregated 1x1 conv.

    out = Wa[b] @ x2_tile + Wb[b] @ lup_tile + bias[b]
    where [Wa | Wb] = (sum_k a_k W_k) * diag(sigmoid CA mask)  (folded in JAX).
    """
    acc = jnp.dot(wa_ref[0], xa_ref[0], preferred_element_type=jnp.float32)
    acc = acc + jnp.dot(wb_ref[0], xb_ref[0], preferred_element_type=jnp.float32)
    o_ref[0] = acc + b_ref[0]


# ----------------------------------------------------------------------------
# pallas_call wrappers
# ----------------------------------------------------------------------------
_COMPILER_PARAMS = pltpu.CompilerParams(
    dimension_semantics=("parallel", "parallel"),   # batch x HW-tiles
    vmem_limit_bytes=32 * 1024 * 1024,              # safe on v5e/v6e/v7x
)


def _pick_hw_tile(hw, max_tile=1024):
    """Largest lane-aligned spatial tile (multiple of 128 or the full extent)."""
    if hw <= max_tile:
        return hw
    for t in (1024, 512, 256, 128):
        if hw % t == 0:
            return t
    return hw  # odd extent: fall back to a single full block


def dyn_conv1x1_apply(x, w_agg, b_agg):
    """x: (B, Cin, HW), w_agg: (B, Cout, Cin), b_agg: (B, Cout, 1) -> (B, Cout, HW)."""
    B, Cin, HW = x.shape
    Cout = w_agg.shape[1]
    thw = _pick_hw_tile(HW)
    grid = (B, HW // thw)

    return pl.pallas_call(
        _dyn_conv1x1_kernel,
        out_shape=jax.ShapeDtypeStruct((B, Cout, HW), jnp.float32),
        grid=grid,
        in_specs=[
            pl.BlockSpec((1, Cout, Cin), lambda b, t: (b, 0, 0)),   # W_agg[b]
            pl.BlockSpec((1, Cout, 1), lambda b, t: (b, 0, 0)),     # bias[b]
            pl.BlockSpec((1, Cin, thw), lambda b, t: (b, 0, t)),    # x tile
        ],
        out_specs=pl.BlockSpec((1, Cout, thw), lambda b, t: (b, 0, t)),
        compiler_params=_COMPILER_PARAMS,
    )(w_agg, b_agg, x)


def fused_ca_dl1_apply(xa, xb, wa, wb, bias):
    """xa, xb: (B, C1, HW); wa, wb: (B, Cout, C1); bias: (B, Cout, 1)."""
    B, C1, HW = xa.shape
    Cout = wa.shape[1]
    thw = _pick_hw_tile(HW)
    grid = (B, HW // thw)

    return pl.pallas_call(
        _fused_ca_dl1_kernel,
        out_shape=jax.ShapeDtypeStruct((B, Cout, HW), jnp.float32),
        grid=grid,
        in_specs=[
            pl.BlockSpec((1, Cout, C1), lambda b, t: (b, 0, 0)),    # Wa[b]
            pl.BlockSpec((1, Cout, C1), lambda b, t: (b, 0, 0)),    # Wb[b]
            pl.BlockSpec((1, Cout, 1), lambda b, t: (b, 0, 0)),     # bias[b]
            pl.BlockSpec((1, C1, thw), lambda b, t: (b, 0, t)),     # x2-out tile
            pl.BlockSpec((1, C1, thw), lambda b, t: (b, 0, t)),     # upsampled-l tile
        ],
        out_specs=pl.BlockSpec((1, Cout, thw), lambda b, t: (b, 0, t)),
        compiler_params=_COMPILER_PARAMS,
    )(wa, wb, bias, xa, xb)


# ----------------------------------------------------------------------------
# JAX pre-passes (tiny (B, C)-sized work hoisted off the hot spatial path)
# ----------------------------------------------------------------------------
def dyn_conv_attention(x_mean, p, temperature):
    """Dynamic_conv2d attention + kernel aggregation from the pooled input.

    x_mean: (B, Cin) global-average-pooled input.
    Returns W_agg (B, Cout, Cin) and bias (B, Cout, 1).
    """
    h = jnp.maximum(x_mean @ p["fc1w"], 0.0)                    # (B, hidden)
    logits = (h @ p["fc2w"] + p["fc2b"]) / temperature          # (B, K)
    att = jax.nn.softmax(logits, axis=-1)                       # (B, K)
    w_agg = jnp.einsum("bk,koi->boi", att, p["w"])              # (B, Cout, Cin)
    b_agg = jnp.einsum("bk,ko->bo", att, p["b"])[..., None]     # (B, Cout, 1)
    return w_agg, b_agg


def ca_channel_mask(mean_c, max_c, p):
    """CA: sigmoid(fus(avgpool) + fus(maxpool)) on (B, C) pooled vectors."""
    def fus(v):
        h = jnp.maximum(v @ p["w1"] + p["b1"], 0.0)
        return h @ p["w2"] + p["b2"]
    return jax.nn.sigmoid(fus(mean_c) + fus(max_c))             # (B, C)


# ----------------------------------------------------------------------------
# Params
# ----------------------------------------------------------------------------
def init_dyn_conv_params(key, cin, cout, K=K_KERNELS, ratio=1):
    hidden = K if cin == 3 else int(cin * ratio) + 1
    k1, k2, k3, k4, k5 = jax.random.split(key, 5)
    return dict(
        fc1w=0.1 * jax.random.normal(k1, (cin, hidden), jnp.float32),
        fc2w=0.1 * jax.random.normal(k2, (hidden, K), jnp.float32),
        fc2b=0.1 * jax.random.normal(k3, (K,), jnp.float32),
        w=0.1 * jax.random.normal(k4, (K, cout, cin), jnp.float32),
        b=0.1 * jax.random.normal(k5, (K, cout), jnp.float32),
    )


def init_ca_params(key, c):
    ch = c // 2
    k1, k2, k3, k4 = jax.random.split(key, 4)
    return dict(
        w1=0.1 * jax.random.normal(k1, (c, ch), jnp.float32),
        b1=0.1 * jax.random.normal(k2, (ch,), jnp.float32),
        w2=0.1 * jax.random.normal(k3, (ch, c), jnp.float32),
        b2=0.1 * jax.random.normal(k4, (c,), jnp.float32),
    )


def init_bm2_params(key, in_channel1, in_channel2):
    k1, k2, k3, k4 = jax.random.split(key, 4)
    return dict(
        u1=init_dyn_conv_params(k1, in_channel2, in_channel1),
        u2=init_dyn_conv_params(k2, in_channel1, in_channel1),
        dl1=init_dyn_conv_params(k3, in_channel1 * 2, in_channel1),
        dca1=init_ca_params(k4, in_channel1 * 2),
    )


# ----------------------------------------------------------------------------
# BM2 forward
# ----------------------------------------------------------------------------
@functools.partial(jax.jit, static_argnames=("size",))
def bm2_forward(params, x2_nchw, x3_nchw, temperature, size):
    B, C1, H, W = x2_nchw.shape
    _, C2, H3, W3 = x3_nchw.shape
    assert H == size and W == size, "torch.cat requires l upsampled to x2's spatial"

    # NCHW -> (B, C, HW): pure reshape, no transpose needed in this layout.
    x2 = x2_nchw.reshape(B, C1, H * W)
    x3 = x3_nchw.reshape(B, C2, H3 * W3)

    # --- self.u2(x2, T): attention pre-pass (JAX) + aggregated conv (Pallas)
    w2a, b2a = dyn_conv_attention(jnp.mean(x2, axis=-1), params["u2"], temperature)
    y2 = dyn_conv1x1_apply(x2, w2a, b2a)                         # (B, C1, H*W)

    # --- self.u1(x3, T)
    w1a, b1a = dyn_conv_attention(jnp.mean(x3, axis=-1), params["u1"], temperature)
    l = dyn_conv1x1_apply(x3, w1a, b1a)                          # (B, C1, H3*W3)

    # --- F.interpolate(l, size), mode='nearest'  (gather glue in JAX)
    l = l.reshape(B, C1, H3, W3)
    rows = (jnp.arange(size) * H3) // size
    cols = (jnp.arange(size) * W3) // size
    l_up = l[:, :, rows][:, :, :, cols].reshape(B, C1, size * size)

    # --- CA(dca1) channel mask + dl1 attention, both folded in JAX (tiny)
    lr_mean = jnp.concatenate([jnp.mean(y2, -1), jnp.mean(l_up, -1)], -1)  # (B, 2C1)
    lr_max = jnp.concatenate([jnp.max(y2, -1), jnp.max(l_up, -1)], -1)     # (B, 2C1)
    mask = ca_channel_mask(lr_mean, lr_max, params["dca1"])                # (B, 2C1)

    # dl1's attention pools its input b = lr * mask; mask is constant over
    # spatial, so mean(b) = mean(lr) * mask exactly.
    wd, bd = dyn_conv_attention(lr_mean * mask, params["dl1"], temperature)
    wd = wd * mask[:, None, :]        # fold CA mask into dl1 input channels
    wa, wb = wd[:, :, :C1], wd[:, :, C1:]

    # --- fused CA + self.dl1(b, T)  (Pallas, no HBM round trip of lr / b)
    out = fused_ca_dl1_apply(y2, l_up, wa, wb, bd)               # (B, C1, H*W)

    return out.reshape(B, C1, H, W)


# ----------------------------------------------------------------------------
if __name__ == "__main__":
    key = jax.random.PRNGKey(0)
    kp, kx2, kx3 = jax.random.split(key, 3)

    B, C1, C2 = 2, 4, 8
    H = W = 16            # spatial of x2 and self.size
    H3 = W3 = 8           # x3 is lower resolution -> nearest-upsampled to size
    size = 16
    temperature = 34.0

    params = init_bm2_params(kp, in_channel1=C1, in_channel2=C2)
    x2 = jax.random.normal(kx2, (B, C1, H, W), jnp.float32)
    x3 = jax.random.normal(kx3, (B, C2, H3, W3), jnp.float32)

    out = bm2_forward(params, x2, x3, temperature, size)
    out = jax.block_until_ready(out)
    assert out.shape == (B, C1, H, W)
    assert bool(jnp.all(jnp.isfinite(out)))
    print("KERNEL_OK")
</pallas_src>

<mosaic_0001>
module attributes {stable_mosaic.version = 11 : i64} {
  func.func @_dyn_conv1x1_kernel(%arg0: i32, %arg1: i32, %arg2: memref<1x4x4xf32, #tpu.memory_space<vmem>>, %arg3: memref<1x4x1xf32, #tpu.memory_space<vmem>>, %arg4: memref<1x4x256xf32, #tpu.memory_space<vmem>>, %arg5: memref<1x4x256xf32, #tpu.memory_space<vmem>>) attributes {dimension_semantics = [#tpu.dimension_semantics<parallel>, #tpu.dimension_semantics<parallel>], iteration_bounds = array<i64: 2, 1>, scalar_prefetch = 0 : i64, scratch_operands = 0 : i64, tpu.core_type = #tpu.core_type<tc>, window_params = [{transform_indices = @transform_0, window_bounds = array<i64: 1, 4, 4>}, {transform_indices = @transform_1, window_bounds = array<i64: 1, 4, 1>}, {transform_indices = @transform_2, window_bounds = array<i64: 1, 4, 256>}, {transform_indices = @transform_3, window_bounds = array<i64: 1, 4, 256>}]} {
    %c0 = arith.constant 0 : index
    %c0_0 = arith.constant 0 : index
    %c0_1 = arith.constant 0 : index
    %0 = vector.load %arg2[%c0, %c0_0, %c0_1] : memref<1x4x4xf32, #tpu.memory_space<vmem>>, vector<1x4x4xf32>
    %1 = vector.shape_cast %0 : vector<1x4x4xf32> to vector<4x4xf32>
    %c0_2 = arith.constant 0 : index
    %c0_3 = arith.constant 0 : index
    %c0_4 = arith.constant 0 : index
    %2 = vector.load %arg4[%c0_2, %c0_3, %c0_4] : memref<1x4x256xf32, #tpu.memory_space<vmem>>, vector<1x4x256xf32>
    %3 = vector.shape_cast %2 : vector<1x4x256xf32> to vector<4x256xf32>
    %cst = arith.constant dense<0.000000e+00> : vector<4x256xf32>
    %4 = tpu.matmul %1, %3, %cst {dimension_numbers = #tpu.dot_dimension_numbers<[1], [0], [0], [1], [0, 0, 1, 1], [], []>} : vector<4x4xf32>, vector<4x256xf32>, vector<4x256xf32> -> vector<4x256xf32>
    %c0_5 = arith.constant 0 : index
    %c0_6 = arith.constant 0 : index
    %c0_7 = arith.constant 0 : index
    %5 = vector.load %arg3[%c0_5, %c0_6, %c0_7] : memref<1x4x1xf32, #tpu.memory_space<vmem>>, vector<1x4x1xf32>
    %6 = vector.shape_cast %5 : vector<1x4x1xf32> to vector<4x1xf32>
    %7 = vector.broadcast %6 : vector<4x1xf32> to vector<4x256xf32>
    %8 = arith.addf %4, %7 : vector<4x256xf32>
    %c0_8 = arith.constant 0 : index
    %c0_9 = arith.constant 0 : index
    %c0_10 = arith.constant 0 : index
    %9 = vector.load %arg5[%c0_8, %c0_9, %c0_10] : memref<1x4x256xf32, #tpu.memory_space<vmem>>, vector<1x4x256xf32>
    %10 = vector.shape_cast %9 : vector<1x4x256xf32> to vector<4x256xf32>
    %11 = vector.shape_cast %8 : vector<4x256xf32> to vector<1x4x256xf32>
    tpu.vector_store %arg5[%c0_8, %c0_9, %c0_10], %11 {strides = array<i32>} : memref<1x4x256xf32, #tpu.memory_space<vmem>>, vector<1x4x256xf32>,
    return
  }
  func.func @transform_0(%arg0: i32, %arg1: i32) -> (i32, i32, i32) {
    %c0_i32 = arith.constant 0 : i32
    %c0_i32_0 = arith.constant 0 : i32
    %c0_i32_1 = arith.constant 0 : i32
    return %arg0, %c0_i32, %c0_i32_0 : i32, i32, i32
  }
  func.func @transform_1(%arg0: i32, %arg1: i32) -> (i32, i32, i32) {
    %c0_i32 = arith.constant 0 : i32
    %c0_i32_0 = arith.constant 0 : i32
    %c0_i32_1 = arith.constant 0 : i32
    return %arg0, %c0_i32, %c0_i32_0 : i32, i32, i32
  }
  func.func @transform_2(%arg0: i32, %arg1: i32) -> (i32, i32, i32) {
    %c0_i32 = arith.constant 0 : i32
    %c0_i32_0 = arith.constant 0 : i32
    return %arg0, %c0_i32, %arg1 : i32, i32, i32
  }
  func.func @transform_3(%arg0: i32, %arg1: i32) -> (i32, i32, i32) {
    %c0_i32 = arith.constant 0 : i32
    %c0_i32_0 = arith.constant 0 : i32
    return %arg0, %c0_i32, %arg1 : i32, i32, i32
  }
}

module attributes {stable_mosaic.version = 11 : i64} {
  func.func @_dyn_conv1x1_kernel(%arg0: i32, %arg1: i32, %arg2: memref<1x4x8xf32, #tpu.memory_space<vmem>>, %arg3: memref<1x4x1xf32, #tpu.memory_space<vmem>>, %arg4: memref<1x8x64xf32, #tpu.memory_space<vmem>>, %arg5: memref<1x4x64xf32, #tpu.memory_space<vmem>>) attributes {dimension_semantics = [#tpu.dimension_semantics<parallel>, #tpu.dimension_semantics<parallel>], iteration_bounds = array<i64: 2, 1>, scalar_prefetch = 0 : i64, scratch_operands = 0 : i64, tpu.core_type = #tpu.core_type<tc>, window_params = [{transform_indices = @transform_0, window_bounds = array<i64: 1, 4, 8>}, {transform_indices = @transform_1, window_bounds = array<i64: 1, 4, 1>}, {transform_indices = @transform_2, window_bounds = array<i64: 1, 8, 64>}, {transform_indices = @transform_3, window_bounds = array<i64: 1, 4, 64>}]} {
    %c0 = arith.constant 0 : index
    %c0_0 = arith.constant 0 : index
    %c0_1 = arith.constant 0 : index
    %0 = vector.load %arg2[%c0, %c0_0, %c0_1] : memref<1x4x8xf32, #tpu.memory_space<vmem>>, vector<1x4x8xf32>
    %1 = vector.shape_cast %0 : vector<1x4x8xf32> to vector<4x8xf32>
    %c0_2 = arith.constant 0 : index
    %c0_3 = arith.constant 0 : index
    %c0_4 = arith.constant 0 : index
    %2 = vector.load %arg4[%c0_2, %c0_3, %c0_4] : memref<1x8x64xf32, #tpu.memory_space<vmem>>, vector<1x8x64xf32>
    %3 = vector.shape_cast %2 : vector<1x8x64xf32> to vector<8x64xf32>
    %cst = arith.constant dense<0.000000e+00> : vector<4x64xf32>
    %4 = tpu.matmul %1, %3, %cst {dimension_numbers = #tpu.dot_dimension_numbers<[1], [0], [0], [1], [0, 0, 1, 1], [], []>} : vector<4x8xf32>, vector<8x64xf32>, vector<4x64xf32> -> vector<4x64xf32>
    %c0_5 = arith.constant 0 : index
    %c0_6 = arith.constant 0 : index
    %c0_7 = arith.constant 0 : index
    %5 = vector.load %arg3[%c0_5, %c0_6, %c0_7] : memref<1x4x1xf32, #tpu.memory_space<vmem>>, vector<1x4x1xf32>
    %6 = vector.shape_cast %5 : vector<1x4x1xf32> to vector<4x1xf32>
    %7 = vector.broadcast %6 : vector<4x1xf32> to vector<4x64xf32>
    %8 = arith.addf %4, %7 : vector<4x64xf32>
    %c0_8 = arith.constant 0 : index
    %c0_9 = arith.constant 0 : index
    %c0_10 = arith.constant 0 : index
    %9 = vector.load %arg5[%c0_8, %c0_9, %c0_10] : memref<1x4x64xf32, #tpu.memory_space<vmem>>, vector<1x4x64xf32>
    %10 = vector.shape_cast %9 : vector<1x4x64xf32> to vector<4x64xf32>
    %11 = vector.shape_cast %8 : vector<4x64xf32> to vector<1x4x64xf32>
    tpu.vector_store %arg5[%c0_8, %c0_9, %c0_10], %11 {strides = array<i32>} : memref<1x4x64xf32, #tpu.memory_space<vmem>>, vector<1x4x64xf32>,
    return
  }
  func.func @transform_0(%arg0: i32, %arg1: i32) -> (i32, i32, i32) {
    %c0_i32 = arith.constant 0 : i32
    %c0_i32_0 = arith.constant 0 : i32
    %c0_i32_1 = arith.constant 0 : i32
    return %arg0, %c0_i32, %c0_i32_0 : i32, i32, i32
  }
  func.func @transform_1(%arg0: i32, %arg1: i32) -> (i32, i32, i32) {
    %c0_i32 = arith.constant 0 : i32
    %c0_i32_0 = arith.constant 0 : i32
    %c0_i32_1 = arith.constant 0 : i32
    return %arg0, %c0_i32, %c0_i32_0 : i32, i32, i32
  }
  func.func @transform_2(%arg0: i32, %arg1: i32) -> (i32, i32, i32) {
    %c0_i32 = arith.constant 0 : i32
    %c0_i32_0 = arith.constant 0 : i32
    return %arg0, %c0_i32, %arg1 : i32, i32, i32
  }
  func.func @transform_3(%arg0: i32, %arg1: i32) -> (i32, i32, i32) {
    %c0_i32 = arith.constant 0 : i32
    %c0_i32_0 = arith.constant 0 : i32
    return %arg0, %c0_i32, %arg1 : i32, i32, i32
  }
}

module attributes {stable_mosaic.version = 11 : i64} {
  func.func @_fused_ca_dl1_kernel(%arg0: i32, %arg1: i32, %arg2: memref<1x4x4xf32, #tpu.memory_space<vmem>>, %arg3: memref<1x4x4xf32, #tpu.memory_space<vmem>>, %arg4: memref<1x4x1xf32, #tpu.memory_space<vmem>>, %arg5: memref<1x4x256xf32, #tpu.memory_space<vmem>>, %arg6: memref<1x4x256xf32, #tpu.memory_space<vmem>>, %arg7: memref<1x4x256xf32, #tpu.memory_space<vmem>>) attributes {dimension_semantics = [#tpu.dimension_semantics<parallel>, #tpu.dimension_semantics<parallel>], iteration_bounds = array<i64: 2, 1>, scalar_prefetch = 0 : i64, scratch_operands = 0 : i64, tpu.core_type = #tpu.core_type<tc>, window_params = [{transform_indices = @transform_0, window_bounds = array<i64: 1, 4, 4>}, {transform_indices = @transform_1, window_bounds = array<i64: 1, 4, 4>}, {transform_indices = @transform_2, window_bounds = array<i64: 1, 4, 1>}, {transform_indices = @transform_3, window_bounds = array<i64: 1, 4, 256>}, {transform_indices = @transform_4, window_bounds = array<i64: 1, 4, 256>}, {transform_indices = @transform_5, window_bounds = array<i64: 1, 4, 256>}]} {
    %c0 = arith.constant 0 : index
    %c0_0 = arith.constant 0 : index
    %c0_1 = arith.constant 0 : index
    %0 = vector.load %arg2[%c0, %c0_0, %c0_1] : memref<1x4x4xf32, #tpu.memory_space<vmem>>, vector<1x4x4xf32>
    %1 = vector.shape_cast %0 : vector<1x4x4xf32> to vector<4x4xf32>
    %c0_2 = arith.constant 0 : index
    %c0_3 = arith.constant 0 : index
    %c0_4 = arith.constant 0 : index
    %2 = vector.load %arg5[%c0_2, %c0_3, %c0_4] : memref<1x4x256xf32, #tpu.memory_space<vmem>>, vector<1x4x256xf32>
    %3 = vector.shape_cast %2 : vector<1x4x256xf32> to vector<4x256xf32>
    %cst = arith.constant dense<0.000000e+00> : vector<4x256xf32>
    %4 = tpu.matmul %1, %3, %cst {dimension_numbers = #tpu.dot_dimension_numbers<[1], [0], [0], [1], [0, 0, 1, 1], [], []>} : vector<4x4xf32>, vector<4x256xf32>, vector<4x256xf32> -> vector<4x256xf32>
    %c0_5 = arith.constant 0 : index
    %c0_6 = arith.constant 0 : index
    %c0_7 = arith.constant 0 : index
    %5 = vector.load %arg3[%c0_5, %c0_6, %c0_7] : memref<1x4x4xf32, #tpu.memory_space<vmem>>, vector<1x4x4xf32>
    %6 = vector.shape_cast %5 : vector<1x4x4xf32> to vector<4x4xf32>
    %c0_8 = arith.constant 0 : index
    %c0_9 = arith.constant 0 : index
    %c0_10 = arith.constant 0 : index
    %7 = vector.load %arg6[%c0_8, %c0_9, %c0_10] : memref<1x4x256xf32, #tpu.memory_space<vmem>>, vector<1x4x256xf32>
    %8 = vector.shape_cast %7 : vector<1x4x256xf32> to vector<4x256xf32>
    %cst_11 = arith.constant dense<0.000000e+00> : vector<4x256xf32>
    %9 = tpu.matmul %6, %8, %cst_11 {dimension_numbers = #tpu.dot_dimension_numbers<[1], [0], [0], [1], [0, 0, 1, 1], [], []>} : vector<4x4xf32>, vector<4x256xf32>, vector<4x256xf32> -> vector<4x256xf32>
    %10 = arith.addf %4, %9 : vector<4x256xf32>
    %c0_12 = arith.constant 0 : index
    %c0_13 = arith.constant 0 : index
    %c0_14 = arith.constant 0 : index
    %11 = vector.load %arg4[%c0_12, %c0_13, %c0_14] : memref<1x4x1xf32, #tpu.memory_space<vmem>>, vector<1x4x1xf32>
    %12 = vector.shape_cast %11 : vector<1x4x1xf32> to vector<4x1xf32>
    %13 = vector.broadcast %12 : vector<4x1xf32> to vector<4x256xf32>
    %14 = arith.addf %10, %13 : vector<4x256xf32>
    %c0_15 = arith.constant 0 : index
    %c0_16 = arith.constant 0 : index
    %c0_17 = arith.constant 0 : index
    %15 = vector.load %arg7[%c0_15, %c0_16, %c0_17] : memref<1x4x256xf32, #tpu.memory_space<vmem>>, vector<1x4x256xf32>
    %16 = vector.shape_cast %15 : vector<1x4x256xf32> to vector<4x256xf32>
    %17 = vector.shape_cast %14 : vector<4x256xf32> to vector<1x4x256xf32>
    tpu.vector_store %arg7[%c0_15, %c0_16, %c0_17], %17 {strides = array<i32>} : memref<1x4x256xf32, #tpu.memory_space<vmem>>, vector<1x4x256xf32>,
    return
  }
  func.func @transform_0(%arg0: i32, %arg1: i32) -> (i32, i32, i32) {
    %c0_i32 = arith.constant 0 : i32
    %c0_i32_0 = arith.constant 0 : i32
    %c0_i32_1 = arith.constant 0 : i32
    return %arg0, %c0_i32, %c0_i32_0 : i32, i32, i32
  }
  func.func @transform_1(%arg0: i32, %arg1: i32) -> (i32, i32, i32) {
    %c0_i32 = arith.constant 0 : i32
    %c0_i32_0 = arith.constant 0 : i32
    %c0_i32_1 = arith.constant 0 : i32
    return %arg0, %c0_i32, %c0_i32_0 : i32, i32, i32
  }
  func.func @transform_2(%arg0: i32, %arg1: i32) -> (i32, i32, i32) {
    %c0_i32 = arith.constant 0 : i32
    %c0_i32_0 = arith.constant 0 : i32
    %c0_i32_1 = arith.constant 0 : i32
    return %arg0, %c0_i32, %c0_i32_0 : i32, i32, i32
  }
  func.func @transform_3(%arg0: i32, %arg1: i32) -> (i32, i32, i32) {
    %c0_i32 = arith.constant 0 : i32
    %c0_i32_0 = arith.constant 0 : i32
    return %arg0, %c0_i32, %arg1 : i32, i32, i32
  }
  func.func @transform_4(%arg0: i32, %arg1: i32) -> (i32, i32, i32) {
    %c0_i32 = arith.constant 0 : i32
    %c0_i32_0 = arith.constant 0 : i32
    return %arg0, %c0_i32, %arg1 : i32, i32, i32
  }
  func.func @transform_5(%arg0: i32, %arg1: i32) -> (i32, i32, i32) {
    %c0_i32 = arith.constant 0 : i32
    %c0_i32_0 = arith.constant 0 : i32
    return %arg0, %c0_i32, %arg1 : i32, i32, i32
  }
}

</mosaic_0001>

<bundles_post_ra>
// kernel: bm2_forward.4
= control target key start
LH: loop header
LB: loop body
LE: loop exit
PB: predicated region body
PF: predicated region fallthrough
CT: control target
= control target key end

     0   :  { %s507_s12 = smov 0   ;;  %s509_s13 = smov 0   ;;  %s546_s0 = inlined_call_operand.vmem [shape: f32[2,4,8], index: 0, kind: input, shape index: {}]   ;;  %s547_s1 = inlined_call_operand.vmem [shape: f32[2,4,1], index: 1, kind: input, shape index: {}]   ;;  %s548_s2 = inlined_call_operand.vmem [shape: f32[2,8,64], index: 2, kind: input, shape index: {}]   ;;  %s549_s3 = inlined_call_operand.vmem [shape: f32[2,4,64], index: 3, kind: output, shape index: {}]  }
   0x1   :  { %s511_s14 = smov 0  }
   0x2 LB: > { %s25_s15 = sadd.s32 1, %s478_s13  ;;  %p417_p0 = scmp.ge.s32.totalorder %s482_s14, 1  ;;  %s482_s14 = sphi %s511_s14, %s13_s14   ;;  %s478_s13 = sphi %s509_s13, %s551_s13   ;;  %s474_s12 = sphi %s507_s12, %s550_s12  }
   0x3   : > { %p27_p1 = scmp.ge.s32.totalorder %s25_s15, 2  ;;  %p173_p2 = scmp.lt.s32.totalorder %s482_s14, 3 }
   0x5   : > { %s553_s15 = smov (%p27_p1, %s25_s15), 0  ;;  %p174_p3 = pnand %p417_p0, %p173_p2 }
   0x6   : > { %p209_p4 = scmp.lt.s32.totalorder (!%p174_p3), %s474_s12, 1  ;;  %v484_v0 = vmov (!%p174_p3), 0.0   ;;  %vm485_vm0 = vmmov (!%p174_p3), 0   ;;  %v486_v1 = vmov (!%p174_p3), 0   ;;  %vm239_vm1 = vcmask (!%p174_p3), 64512  }
   0x7   : > { %177 = sbr.rel (%p174_p3) target bundleno = 234 (0xea), region = 32  ;;  %427 = vmatprep.subr.mxu0 (!%p174_p3), %v484_v0  ;;  %429 = vmatprep.mubr.msk.f32.mxu0 (!%p174_p3), %vm485_vm0, %v484_v0  ;;  %vm313_vm2 = vcmask (!%p174_p3), 519168  }
   0x8   : > { %459 = vset.pattern.permute.xlu0 (!%p174_p3), %v486_v1 }
   0xe   : > { %s555_s12 = smov (!%p209_p4, %s474_s12), 1 }
   0xf   : > { %s418_s16 = sshll.u32 %s555_s12, 2  ;;  %s420_s17 = sshll.u32 %s555_s12, 3 }
  0x10   : > { %s223_s20 = scalar_lea.vmem %s548_s2, %s420_s17  ;;  %s212_s23 = scalar_lea.vmem %s546_s0, %s418_s16 }
  0x11   : > { %v232_v2 = vld [vmem:[%s223_s20] sm:$0xff]  ;;  %s216_s26 = scalar_lea.vmem %s547_s1, %s418_s16  ;;  %s230_s29 = scalar_lea.vmem %s549_s3, %s418_s16 }
  0x12   : > { %v231_v3 = vld [vmem:[%s212_s23] sm:$0xf]  ;;  %428 = vmatpush3.msra.mxu0 %v232_v2 }
  0x13   : > { %v233_v4 = vld [vmem:[%s216_s26] sm:$0xf]  ;;  %430 = vmatmul.mubr.msk.f32.vlgmr.msra.gmra.mrb[0].mxu0 %vm239_vm1, %v231_v3 }
  0x14   : > { %236 = vperm.xlu0 %459, %v233_v4  }
  0x93   : > { %v237_v5 = vpop.permute.xlu0 %236 }
  0xe6   : > { %v309_v6 = vpop.f32.mrb[0].mxu0 }
  0xe7   : > { %v310_v7 = vadd.f32 %v309_v6, %v237_v5  ;;  %v431_v8 = vpop.f32.mrb[1].mxu0 }
  0xe9   : > { %314 = vst.msk [vmem:[%s230_s29] sm:$0xf] %vm313_vm2, %v310_v7 }
  0xea PF: > { %s13_s14 = sadd.s32 1, %s482_s14   ;;  %s550_s12 = smov %s478_s13 }
  0xeb   : > { %p10_p5 = scmp.ge.s32.totalorder %s13_s14, 4   ;;  %s551_s13 = smov %s553_s15 }
  0xed   :  { %12 = sbr.rel (!%p10_p5) target bundleno = 2 (0x2), region = 68 }

// kernel: bm2_forward.3
= control target key start
LH: loop header
LB: loop body
LE: loop exit
PB: predicated region body
PF: predicated region fallthrough
CT: control target
= control target key end

     0   :  { %s542_s12 = smov 0   ;;  %s544_s13 = smov 0   ;;  %s581_s0 = inlined_call_operand.vmem [shape: f32[2,4,4], index: 0, kind: input, shape index: {}]   ;;  %s582_s1 = inlined_call_operand.vmem [shape: f32[2,4,1], index: 1, kind: input, shape index: {}]   ;;  %s583_s2 = inlined_call_operand.vmem [shape: f32[2,4,256], index: 2, kind: input, shape index: {}]   ;;  %s584_s3 = inlined_call_operand.vmem [shape: f32[2,4,256], index: 3, kind: output, shape index: {}]  }
   0x1   :  { %s546_s14 = smov 0  }
   0x2 LB: > { %s25_s15 = sadd.s32 1, %s514_s13  ;;  %p454_p0 = scmp.ge.s32.totalorder %s518_s14, 1  ;;  %s518_s14 = sphi %s546_s14, %s13_s14   ;;  %s514_s13 = sphi %s544_s13, %s586_s13   ;;  %s510_s12 = sphi %s542_s12, %s585_s12  }
   0x3   : > { %p27_p1 = scmp.ge.s32.totalorder %s25_s15, 2  ;;  %p176_p2 = scmp.lt.s32.totalorder %s518_s14, 3 }
   0x5   : > { %s588_s15 = smov (%p27_p1, %s25_s15), 0  ;;  %p177_p3 = pnand %p454_p0, %p176_p2 }
   0x6   : > { %p216_p4 = scmp.lt.s32.totalorder (!%p177_p3), %s510_s12, 1  ;;  %v520_v0 = vmov (!%p177_p3), 0.0   ;;  %v521_v1 = vmov (!%p177_p3), 0   ;;  %vm258_vm0 = vcmask (!%p177_p3), 1043456   ;;  %vm254_vm1 = vcmask (!%p177_p3), 31744  }
   0x7   : > { %180 = sbr.rel (%p177_p3) target bundleno = 240 (0xf0), region = 32  ;;  %327 = vmatprep.mubr.f32.mxu0 (!%p177_p3), %v520_v0  ;;  %494 = vset.pattern.permute.xlu0 (!%p177_p3), %v521_v1 }
   0xe   : > { %s590_s12 = smov (!%p216_p4, %s510_s12), 1 }
   0xf   : > { %s466_s16 = sshll.u32 %s590_s12, 3  ;;  %s455_s17 = sshll.u32 %s590_s12, 2 }
  0x10   : > { %s232_s20 = scalar_lea.vmem %s583_s2, %s466_s16  ;;  %s219_s23 = scalar_lea.vmem %s581_s0, %s455_s17 }
  0x11   : > { %v245_v2 = vld [vmem:[%s232_s20] sm:$0xff]  ;;  %s223_s26 = scalar_lea.vmem %s582_s1, %s455_s17  ;;  %s242_s29 = scalar_lea.vmem %s584_s3, %s466_s16 }
  0x12   : > { %v253_v3 = vcombine.high %v245_v2, %v245_v2  ;;  %v246_v4 = vld [vmem:[%s223_s26] sm:$0xf] }
  0x13   : > { %v244_v5 = vld [vmem:[%s219_s23] sm:$0xf]  ;;  %249 = vperm.xlu0 %494, %v246_v4  }
  0x14   : > { %461 = vmatprep.subr.msk.mxu0 %vm258_vm0, %v253_v3 }
  0x15   : > { %462 = vmatpush1.msk.msra.mxu0 %vm258_vm0, %v245_v2 }
  0x16   : > { %463 = vmatmul.mubr.msk.f32.vlgmr.msra.gmra.mrb[0].mxu0 %vm254_vm1, %v244_v5 }
  0x92   : > { %v250_v6 = vpop.permute.xlu0 %249 }
  0xe9   : > { %v329_v7 = vpop.f32.mrb[0].mxu0 }
  0xea   : > { %v330_v8 = vadd.f32 %v329_v7, %v250_v6  ;;  %v331_v9 = vpop.f32.mrb[1].mxu0 }
  0xeb   : > { %v332_v10 = vadd.f32 %v331_v9, %v250_v6 }
  0xed   : > { %v336_v11 = vcombine.low %v330_v8, %v332_v10 }
  0xef   : > { %338 = vst [vmem:[%s242_s29] sm:$0xff] %v336_v11 }
  0xf0 PF: > { %s13_s14 = sadd.s32 1, %s518_s14   ;;  %s585_s12 = smov %s514_s13 }
  0xf1   : > { %p10_p5 = scmp.ge.s32.totalorder %s13_s14, 4   ;;  %s586_s13 = smov %s588_s15 }
  0xf3   :  { %12 = sbr.rel (!%p10_p5) target bundleno = 2 (0x2), region = 68 }

// kernel: bm2_forward.5
= control target key start
LH: loop header
LB: loop body
LE: loop exit
PB: predicated region body
PF: predicated region fallthrough
CT: control target
= control target key end

     0   :  { %s783_s18 = smov 0   ;;  %s785_s19 = smov 0   ;;  %s833_s0 = inlined_call_operand.vmem [shape: f32[2,4,4], index: 0, kind: input, shape index: {}]   ;;  %s834_s1 = inlined_call_operand.vmem [shape: f32[2,4,4], index: 1, kind: input, shape index: {}]   ;;  %s835_s2 = inlined_call_operand.vmem [shape: f32[2,4,1], index: 2, kind: input, shape index: {}]   ;;  %s836_s3 = inlined_call_operand.vmem [shape: f32[2,4,256], index: 3, kind: input, shape index: {}]   ;;  %s837_s4 = inlined_call_operand.vmem [shape: f32[2,4,256], index: 4, kind: input, shape index: {}]   ;;  %s838_s5 = inlined_call_operand.vmem [shape: f32[2,4,256], index: 5, kind: output, shape index: {}]  }
   0x1   :  { %s787_s20 = smov 0  }
   0x2 LB: > { %s27_s21 = sadd.s32 1, %s745_s19  ;;  %p675_p0 = scmp.ge.s32.totalorder %s749_s20, 1  ;;  %s749_s20 = sphi %s787_s20, %s15_s20   ;;  %s745_s19 = sphi %s785_s19, %s840_s19   ;;  %s741_s18 = sphi %s783_s18, %s839_s18  }
   0x3   : > { %p29_p1 = scmp.ge.s32.totalorder %s27_s21, 2  ;;  %p252_p2 = scmp.lt.s32.totalorder %s749_s20, 3 }
   0x5   : > { %s842_s21 = smov (%p29_p1, %s27_s21), 0  ;;  %p253_p3 = pnand %p675_p0, %p252_p2 }
   0x6   : > { %p309_p4 = scmp.lt.s32.totalorder (!%p253_p3), %s741_s18, 1  ;;  %v751_v0 = vmov (!%p253_p3), 0.0   ;;  %v752_v1 = vmov (!%p253_p3), 0   ;;  %vm361_vm0 = vcmask (!%p253_p3), 1043456   ;;  %vm357_vm1 = vcmask (!%p253_p3), 31744  }
   0x7   : > { %256 = sbr.rel (%p253_p3) target bundleno = 243 (0xf3), region = 40  ;;  %430 = vmatprep.mubr.f32.mxu1 (!%p253_p3), %v751_v0  ;;  %510 = vmatprep.mubr.f32.mxu0 (!%p253_p3), %v751_v0 }
   0x8   : > { %724 = vset.pattern.permute.xlu0 (!%p253_p3), %v752_v1 }
   0xe   : > { %s844_s18 = smov (!%p309_p4, %s741_s18), 1 }
   0xf   : > { %s801_s22 = sshll.u32 %s844_s18, 3  ;;  %s676_s23 = sshll.u32 %s844_s18, 2 }
  0x10   : > { %s339_s26 = scalar_lea.vmem %s837_s4, %s801_s22  ;;  %s329_s29 = scalar_lea.vmem %s836_s3, %s801_s22 }
  0x11   : > { %v354_v2 = vld [vmem:[%s339_s26] sm:$0xff]  ;;  %s316_s7 = scalar_lea.vmem %s834_s1, %s676_s23  ;;  %s312_s10 = scalar_lea.vmem %s833_s0, %s676_s23 }
  0x12   : > { %v352_v3 = vld [vmem:[%s329_s29] sm:$0xff]  ;;  %v356_v4 = vcombine.high %v354_v2, %v354_v2  ;;  %s320_s13 = scalar_lea.vmem %s835_s2, %s676_s23  ;;  %s349_s16 = scalar_lea.vmem %s838_s5, %s801_s22 }
  0x13   : > { %v438_v5 = vcombine.high %v352_v3, %v352_v3  ;;  %v353_v6 = vld [vmem:[%s316_s7] sm:$0xf] }
  0x14   : > { %v351_v7 = vld [vmem:[%s312_s10] sm:$0xf]  ;;  %685 = vmatprep.subr.msk.mxu1 %vm361_vm0, %v356_v4 }
  0x15   : > { %688 = vmatprep.subr.msk.mxu0 %vm361_vm0, %v438_v5  ;;  %v517_v8 = vld [vmem:[%s320_s13] sm:$0xf]  ;;  %686 = vmatpush1.msk.msra.mxu1 %vm361_vm0, %v354_v2 }
  0x16   : > { %689 = vmatpush1.msk.msra.mxu0 %vm361_vm0, %v352_v3  ;;  %687 = vmatmul.mubr.msk.f32.vlgmr.msra.gmra.mrb[0].mxu1 %vm357_vm1, %v353_v6 }
  0x17   : > { %690 = vmatmul.mubr.msk.f32.vlgmr.msra.gmra.mrb[0].mxu0 %vm357_vm1, %v351_v7  ;;  %520 = vperm.xlu0 %724, %v517_v8  }
  0x96   : > { %v521_v9 = vpop.permute.xlu0 %520 }
  0xe9   : > { %v432_v10 = vpop.f32.mrb[0].mxu1 }
  0xea   : > { %v512_v11 = vpop.f32.mrb[0].mxu0  ;;  %v434_v13 = vpop.f32.mrb[1].mxu1 }
  0xeb   : > { %v513_v12 = vadd.f32 %v512_v11, %v432_v10  ;;  %v514_v14 = vpop.f32.mrb[1].mxu0 }
  0xec   : > { %v515_v15 = vadd.f32 %v514_v14, %v434_v13 }
  0xed   : > { %v523_v16 = vadd.f32 %v521_v9, %v513_v12 }
  0xee   : > { %v524_v17 = vadd.f32 %v521_v9, %v515_v15 }
  0xf0   : > { %v527_v18 = vcombine.low %v523_v16, %v524_v17 }
  0xf2   : > { %529 = vst [vmem:[%s349_s16] sm:$0xff] %v527_v18 }
  0xf3 PF: > { %s15_s20 = sadd.s32 1, %s749_s20   ;;  %s839_s18 = smov %s745_s19 }
  0xf4   : > { %p12_p5 = scmp.ge.s32.totalorder %s15_s20, 4   ;;  %s840_s19 = smov %s842_s21 }
  0xf6   :  { %14 = sbr.rel (!%p12_p5) target bundleno = 2 (0x2), region = 82 }

</bundles_post_ra>
